<compile_context>
chip_gen: v7x
topology: tpu7x:2x2x1
jax: 0.10.0
libtpu: 0.0.40
codegen_flags: <defaults>
</compile_context>

<pallas_src>
import jax
import jax.numpy as jnp
from jax.experimental import pallas as pl
from jax.experimental.pallas import tpu as pltpu


def _round_up(n, m):
    return ((n + m - 1) // m) * m


def _max_identity(dtype):
    dtype = jnp.dtype(dtype)
    if dtype == jnp.bool_:
        return False
    if jnp.issubdtype(dtype, jnp.floating):
        return float("-inf")
    return int(jnp.iinfo(dtype).min)


def _make_kernel(*, R, TR, TQ, SUB, pad_val, multi_r, grid_r):
    """Builds the max-pool kernel.

    Single-r-block case: one XLU sublane reduce + lane-dense store.
    Multi-r-block case : VALU-only running max into a (SUB, TQ) scratch,
                         XLU reduce + store deferred to the last r-step.
    """
    if not multi_r:
        def kernel(x_ref, o_ref):
            tile = x_ref[0]                                   # (R, TQ)
            o_ref[...] = jnp.max(tile, axis=0).reshape(1, 1, TQ)
        return kernel

    need_mask = (R % TR) != 0

    def kernel(x_ref, o_ref, acc_ref):
        r = pl.program_id(2)
        tile = x_ref[0]                                       # (TR, TQ)
        if need_mask:
            row = jax.lax.broadcasted_iota(jnp.int32, (TR, TQ), 0)
            fill = jnp.array(pad_val, dtype=tile.dtype)
            tile = jnp.where(r * TR + row < R, tile, fill)
        if TR == SUB:
            part = tile                                       # (SUB, TQ)
        else:
            # Fold sublane groups with elementwise maxima (VALU only).
            part = jnp.max(tile.reshape(TR // SUB, SUB, TQ), axis=0)

        @pl.when(r == 0)
        def _init():
            acc_ref[...] = part

        @pl.when(r != 0)
        def _accumulate():
            acc_ref[...] = jnp.maximum(acc_ref[...], part)

        @pl.when(r == grid_r - 1)
        def _finalize():
            o_ref[...] = jnp.max(acc_ref[...], axis=0).reshape(1, 1, TQ)

    return kernel


def featurewise_max_pool(x, axis, *, tm_max=2048, vmem_budget=4 * 1024 * 1024,
                         pipeline_split_bytes=1 << 20):
    """Equivalent of torch.max(x, dim=axis)[0] via one pallas_call."""
    ndim = x.ndim
    axis = axis % ndim
    kept_shape = x.shape[:axis] + x.shape[axis + 1:]
    R = x.shape[axis]
    dtype = jnp.dtype(x.dtype)
    itemsize = dtype.itemsize
    pad_val = _max_identity(dtype)
    packed = max(8, 32 // itemsize)          # packed sublane count for dtype

    if axis == ndim - 1 and ndim > 1:
        # Reducing the minor (lane) axis: one unavoidable transpose so the
        # kept dims land on lanes.
        # TODO(synk): lane-axis reduce without a transpose (narrow-store path).
        x3 = jnp.moveaxis(x, axis, 0).reshape(1, R, -1)
    else:
        P = 1
        for d in x.shape[:axis]:
            P *= d
        x3 = x.reshape(P, R, -1)             # order-preserving view; free
    P, _, Q = x3.shape

    # ---- lane (Q) tiling: lane-dense, one block when it fits ---------------
    TQ = Q if Q <= tm_max else tm_max        # tm_max is a multiple of 128
    grid_q = pl.cdiv(Q, TQ)

    # v7x has two TensorCores: give the "parallel" axes >= 2 blocks when cheap.
    if P * grid_q == 1 and Q >= 256:
        TQ = _round_up(pl.cdiv(Q, 2), 128)
        grid_q = pl.cdiv(Q, TQ)

    # ---- reduction (R) tiling ----------------------------------------------
    row_bytes = TQ * itemsize
    budget_rows = max(packed, (vmem_budget // row_bytes) // packed * packed)
    if R <= budget_rows:
        if R * row_bytes >= pipeline_split_bytes and R >= 4 * packed:
            TR = _round_up(pl.cdiv(R, 4), packed)   # overlap DMA with the max
        else:
            TR = R
    else:
        TR = budget_rows
    grid_r = pl.cdiv(R, TR)
    if grid_r == 1:
        TR = R                                      # block == full dim, no mask
    multi_r = grid_r > 1

    kernel = _make_kernel(R=R, TR=TR, TQ=TQ, SUB=packed, pad_val=pad_val,
                          multi_r=multi_r, grid_r=grid_r)
    scratch = [pltpu.VMEM((packed, TQ), dtype)] if multi_r else []

    out = pl.pallas_call(
        kernel,
        out_shape=jax.ShapeDtypeStruct((P, 1, Q), dtype),
        grid=(P, grid_q, grid_r),
        in_specs=[pl.BlockSpec((1, TR, TQ), lambda p, q, r: (p, r, q))],
        out_specs=pl.BlockSpec((1, 1, TQ), lambda p, q, r: (p, 0, q)),
        scratch_shapes=scratch,
        compiler_params=pltpu.CompilerParams(
            dimension_semantics=("parallel", "parallel", "arbitrary")),
        cost_estimate=pl.CostEstimate(
            flops=P * R * Q,
            transcendentals=0,
            bytes_accessed=(P * R * Q + P * Q) * itemsize),
    )(x3)

    return out.reshape(kept_shape)


if __name__ == "__main__":
    key = jax.random.PRNGKey(0)
    k1, k2, k3, k4 = jax.random.split(key, 4)

    # Case 1: relational-RL usage — (n_pixels, batch, n_features), axis=0.
    x1 = jax.random.normal(k1, (256, 2, 64), jnp.float32)
    out1 = jax.block_until_ready(featurewise_max_pool(x1, axis=0))
    ref1 = jnp.max(x1, axis=0)
    assert out1.shape == ref1.shape, (out1.shape, ref1.shape)
    assert bool(jnp.all(out1 == ref1)), "mismatch vs jnp.max (axis=0)"

    # Case 2: interior axis — channel max on NCHW, axis=1 (no transpose pass).
    x2 = jax.random.normal(k2, (2, 4, 16, 16), jnp.float32)
    out2 = jax.block_until_ready(featurewise_max_pool(x2, axis=1))
    ref2 = jnp.max(x2, axis=1)
    assert out2.shape == ref2.shape, (out2.shape, ref2.shape)
    assert bool(jnp.all(out2 == ref2)), "mismatch vs jnp.max (axis=1)"

    # Case 3: tiny VMEM budget to exercise the tiled-R path with a masked tail.
    x3 = jax.random.normal(k3, (100, 3, 40), jnp.float32)
    out3 = jax.block_until_ready(
        featurewise_max_pool(x3, axis=0, vmem_budget=8 * 1024))
    ref3 = jnp.max(x3, axis=0)
    assert out3.shape == ref3.shape, (out3.shape, ref3.shape)
    assert bool(jnp.all(out3 == ref3)), "mismatch vs jnp.max (tiled R)"

    # Case 4: last-axis fallback (transpose path) with bf16 packed sublanes.
    x4 = jax.random.normal(k4, (2, 8, 40), jnp.float32).astype(jnp.bfloat16)
    out4 = jax.block_until_ready(featurewise_max_pool(x4, axis=2))
    ref4 = jnp.max(x4, axis=2)
    assert out4.shape == ref4.shape, (out4.shape, ref4.shape)
    assert bool(jnp.all(out4 == ref4)), "mismatch vs jnp.max (axis=-1)"

    print("KERNEL_OK")
</pallas_src>

<mosaic_0001>
module attributes {stable_mosaic.version = 11 : i64} {
  func.func @kernel(%arg0: i32, %arg1: i32, %arg2: i32, %arg3: memref<1x256x128xf32, #tpu.memory_space<vmem>>, %arg4: memref<1x1x128xf32, #tpu.memory_space<vmem>>) attributes {dimension_semantics = [#tpu.dimension_semantics<parallel>, #tpu.dimension_semantics<parallel>, #tpu.dimension_semantics<arbitrary>], iteration_bounds = array<i64: 1, 1, 1>, scalar_prefetch = 0 : i64, scratch_operands = 0 : i64, tpu.core_type = #tpu.core_type<tc>, window_params = [{transform_indices = @transform_0, window_bounds = array<i64: 1, 256, 128>}, {transform_indices = @transform_1, window_bounds = array<i64: 1, 1, 128>}]} {
    %c0 = arith.constant 0 : index
    %c0_0 = arith.constant 0 : index
    %c0_1 = arith.constant 0 : index
    %0 = vector.load %arg3[%c0, %c0_0, %c0_1] : memref<1x256x128xf32, #tpu.memory_space<vmem>>, vector<1x256x128xf32>
    %1 = vector.shape_cast %0 : vector<1x256x128xf32> to vector<256x128xf32>
    %cst = arith.constant dense<0xFF800000> : vector<128xf32>
    %2 = vector.multi_reduction <maximumf>, %1, %cst [0] : vector<256x128xf32> to vector<128xf32>
    %3 = vector.shape_cast %2 : vector<128xf32> to vector<1x1x128xf32>
    %c0_2 = arith.constant 0 : index
    %c0_3 = arith.constant 0 : index
    %c0_4 = arith.constant 0 : index
    %4 = vector.load %arg4[%c0_2, %c0_3, %c0_4] : memref<1x1x128xf32, #tpu.memory_space<vmem>>, vector<1x1x128xf32>
    tpu.vector_store %arg4[%c0_2, %c0_3, %c0_4], %3 {strides = array<i32>} : memref<1x1x128xf32, #tpu.memory_space<vmem>>, vector<1x1x128xf32>,
    return
  }
  func.func @transform_0(%arg0: i32, %arg1: i32, %arg2: i32) -> (i32, i32, i32) {
    %c0_i32 = arith.constant 0 : i32
    return %arg0, %arg2, %arg1 : i32, i32, i32
  }
  func.func @transform_1(%arg0: i32, %arg1: i32, %arg2: i32) -> (i32, i32, i32) {
    %c0_i32 = arith.constant 0 : i32
    %c0_i32_0 = arith.constant 0 : i32
    return %arg0, %c0_i32, %arg1 : i32, i32, i32
  }
}

</mosaic_0001>

<bundles_post_ra>
// kernel: tpu_custom_call.1
= control target key start
LH: loop header
LB: loop body
LE: loop exit
PB: predicated region body
PF: predicated region fallthrough
CT: control target
= control target key end

     0   :  { %6 = vsyncpa [#allocation3], 0  ;;  %s198_s0 = inlined_call_operand.hbm [shape: f32[1,256,128], index: 0, kind: input, shape index: {}]   ;;  %s199_s1 = inlined_call_operand.hbm [shape: f32[1,1,128], index: 1, kind: output, shape index: {}]  }
   0x1   :  { %7 = vsyncpa [#allocation4], 0  ;;  %s160_s6 = smov [#allocation2]   ;;  %s112_s10 = scalar_lea.hbm %s198_s0, 4096 }
   0x2   :  { %s13_s7 = sshll.u32 %s160_s6, 4  ;;  %p113_p0 = scmp.ne.s32.totalorder %s198_s0, %s112_s10  ;;  %s14_s7 = int_to_ptr.vmem [resolvable:$true] %s13_s7 }
   0x3   :  { %p116_p1 = scmp.lt.u32.totalorder %s112_s10, %s198_s0 }
   0x5   :  { %p118_p2 = pnand %p116_p1, %p113_p0 }
   0x7   :  { %121 = shalt.err (!%p118_p2)
}
   0x8   :  { %s122_s15 = scalar_lea.vmem %s14_s7, 4096  ;;  %p127_p4 = scmp.lt.s32.totalorder %s14_s7, %s14_s7 }
   0x9   :  { %p123_p3 = scmp.ne.s32.totalorder %s14_s7, %s122_s15  ;;  %p128_p5 = scmp.lt.s32.totalorder %s122_s15, %s122_s15 }
   0xb   :  { %p129_p6 = por %p128_p5, %p127_p4 }
   0xd   :  { %p130_p7 = pnand %p129_p6, %p123_p3 }
   0xf   :  { %133 = shalt.err (!%p130_p7)
}
  0x10   :  { %s161_s16 = smov 128   ;;  %s162_s17 = smov 8  }
  0x11   :  { %19 = dma.hbm_to_vmem [thread:$0]  %s198_s0, 4096, %s14_s7, [#allocation3], %s161_s16, %s161_s16, %s162_s17  }
  0x12   :  { %156 = dma.done.wait [#allocation3], 4096  }
  0x13   :  { %157 = vsyncadd [#allocation3], 4294963200  ;;  %v23_v0 = vld [vmem:[#allocation2] sm:$0xff]  ;;  %v24_v1 = vld [vmem:[#allocation2 + $0x8] sm:$0xff]  ;;  %s163_s0 = smov [#allocation5]  }
  0x14   :  { %v25_v2 = vld [vmem:[#allocation2 + $0x10] sm:$0xff]  ;;  %v26_v3 = vld [vmem:[#allocation2 + $0x18] sm:$0xff]  ;;  %v27_v4 = vld [vmem:[#allocation2 + $0x20] sm:$0xff]  ;;  %s99_s20 = sshll.u32 %s163_s0, 4  ;;  %s100_s20 = int_to_ptr.vmem [resolvable:$true] %s99_s20 }
  0x15   :  { %v28_v5 = vld [vmem:[#allocation2 + $0x28] sm:$0xff]  ;;  %v29_v6 = vld [vmem:[#allocation2 + $0x30] sm:$0xff]  ;;  %v30_v7 = vld [vmem:[#allocation2 + $0x38] sm:$0xff]  ;;  %v55_v9 = vmax.f32 %v23_v0, %v27_v4  ;;  %s134_s21 = scalar_lea.vmem %s100_s20, 16  ;;  %s138_s22 = scalar_lea.vmem %s100_s20, 32 }
  0x16   :  { %v31_v8 = vld [vmem:[#allocation2 + $0x40] sm:$0xff]  ;;  %v56_v10 = vmax.f32 %v24_v1, %v28_v5  ;;  %v32_v11 = vld [vmem:[#allocation2 + $0x48] sm:$0xff]  ;;  %v33_v12 = vld [vmem:[#allocation2 + $0x50] sm:$0xff]  ;;  %v57_v14 = vmax.f32 %v25_v2, %v29_v6  ;;  %v58_v15 = vmax.f32 %v26_v3, %v30_v7  ;;  %p135_p8 = scmp.ne.s32.totalorder %s100_s20, %s134_s21  ;;  %p139_p9 = scmp.lt.s32.totalorder %s100_s20, %s100_s20 }
  0x17   :  { %v34_v13 = vld [vmem:[#allocation2 + $0x58] sm:$0xff]  ;;  %v35_v16 = vld [vmem:[#allocation2 + $0x60] sm:$0xff]  ;;  %v36_v17 = vld [vmem:[#allocation2 + $0x68] sm:$0xff]  ;;  %v59_v19 = vmax.f32 %v55_v9, %v31_v8  ;;  %p140_p10 = scmp.lt.s32.totalorder %s138_s22, %s134_s21 }
  0x18   :  { %v37_v18 = vld [vmem:[#allocation2 + $0x70] sm:$0xff]  ;;  %v60_v20 = vmax.f32 %v56_v10, %v32_v11  ;;  %v38_v21 = vld [vmem:[#allocation2 + $0x78] sm:$0xff]  ;;  %v39_v22 = vld [vmem:[#allocation2 + $0x80] sm:$0xff]  ;;  %v61_v24 = vmax.f32 %v57_v14, %v33_v12  ;;  %v62_v25 = vmax.f32 %v58_v15, %v34_v13 }
  0x19   :  { %v40_v23 = vld [vmem:[#allocation2 + $0x88] sm:$0xff]  ;;  %v41_v26 = vld [vmem:[#allocation2 + $0x90] sm:$0xff]  ;;  %v42_v27 = vld [vmem:[#allocation2 + $0x98] sm:$0xff]  ;;  %v63_v28 = vmax.f32 %v59_v19, %v35_v16  ;;  %p141_p11 = por %p140_p10, %p139_p9 }
  0x1a   :  { %v64_v29 = vmax.f32 %v60_v20, %v36_v17  ;;  %v43_v30 = vld [vmem:[#allocation2 + $0xa0] sm:$0xff]  ;;  %v44_v31 = vld [vmem:[#allocation2 + $0xa8] sm:$0xff]  ;;  %v65_v32 = vmax.f32 %v61_v24, %v37_v18  ;;  %v66_v33 = vmax.f32 %v62_v25, %v38_v21  ;;  %v45_v34 = vld [vmem:[#allocation2 + $0xb0] sm:$0xff] }
  0x1b   :  { %v46_v35 = vld [vmem:[#allocation2 + $0xb8] sm:$0xff]  ;;  %v67_v36 = vmax.f32 %v63_v28, %v39_v22  ;;  %v47_v38 = vld [vmem:[#allocation2 + $0xc0] sm:$0xff]  ;;  %v48_v39 = vld [vmem:[#allocation2 + $0xc8] sm:$0xff]  ;;  %p142_p12 = pnand %p141_p11, %p135_p8 }
  0x1c   :  { %v68_v37 = vmax.f32 %v64_v29, %v40_v23  ;;  %v69_v40 = vmax.f32 %v65_v32, %v41_v26  ;;  %v70_v41 = vmax.f32 %v66_v33, %v42_v27  ;;  %v49_v42 = vld [vmem:[#allocation2 + $0xd0] sm:$0xff]  ;;  %v50_v43 = vld [vmem:[#allocation2 + $0xd8] sm:$0xff]  ;;  %v51_v46 = vld [vmem:[#allocation2 + $0xe0] sm:$0xff] }
  0x1d   :  { %v71_v44 = vmax.f32 %v67_v36, %v43_v30  ;;  %v52_v47 = vld [vmem:[#allocation2 + $0xe8] sm:$0xff]  ;;  %v53_v50 = vld [vmem:[#allocation2 + $0xf0] sm:$0xff]  ;;  %v54_v51 = vld [vmem:[#allocation2 + $0xf8] sm:$0xff] }
  0x1e   :  { %v72_v45 = vmax.f32 %v68_v37, %v44_v31  ;;  %v73_v48 = vmax.f32 %v69_v40, %v45_v34  ;;  %v74_v49 = vmax.f32 %v70_v41, %v46_v35 }
  0x1f   :  { %v75_v52 = vmax.f32 %v71_v44, %v47_v38 }
  0x20   :  { %v76_v53 = vmax.f32 %v72_v45, %v48_v39  ;;  %v77_v54 = vmax.f32 %v73_v48, %v49_v42  ;;  %v78_v55 = vmax.f32 %v74_v49, %v50_v43 }
  0x21   :  { %v79_v56 = vmax.f32 %v75_v52, %v51_v46 }
  0x22   :  { %v80_v57 = vmax.f32 %v76_v53, %v52_v47  ;;  %v81_v58 = vmax.f32 %v77_v54, %v53_v50  ;;  %v82_v59 = vmax.f32 %v78_v55, %v54_v51 }
  0x24   :  { %v83_v60 = vmax.f32 %v79_v56, %v80_v57  ;;  %v84_v61 = vmax.f32 %v81_v58, %v82_v59 }
  0x26   :  { %v85_v62 = vmax.f32 %v83_v60, %v84_v61 }
  0x28   :  { %v86_v63 = vrot.slane %v85_v62, 4 }
  0x2a   :  { %v87_v0 = vmax.f32 %v85_v62, %v86_v63 }
  0x2c   :  { %v88_v1 = vrot.slane %v87_v0, 2 }
  0x2e   :  { %v89_v2 = vmax.f32 %v87_v0, %v88_v1 }
  0x30   :  { %v90_v3 = vrot.slane %v89_v2, 1 }
  0x32   :  { %v91_v4 = vmax.f32 %v89_v2, %v90_v3 }
  0x34   :  { %92 = vst [vmem:[#allocation5] sm:$0x1] %v91_v4 }
  0x35   :  { %145 = shalt.err (!%p142_p12)
}
  0x36   :  { %s146_s25 = scalar_lea.hbm %s199_s1, 16 }
  0x37   :  { %p147_p13 = scmp.ne.s32.totalorder %s199_s1, %s146_s25  ;;  %p150_p0 = scmp.lt.u32.totalorder %s146_s25, %s199_s1 }
  0x39   :  { %p152_p1 = pnand %p150_p0, %p147_p13 }
  0x3b   :  { %155 = shalt.err (!%p152_p1)
}
  0x3c   :  { %102 = dma.vmem_to_hbm [thread:$0]  %s100_s20, 16, %s199_s1, [#allocation4]  }
  0x3d   :  { %158 = dma.done.wait [#allocation4], 16  }
  0x3e   :  { %159 = vsyncadd [#allocation4], 4294967280 }
  0x3f   :  { %106 = vsyncpa [#allocation3], 1 }
  0x40   :  { %107 = vsyncpa [#allocation4], 1 }

</bundles_post_ra>
